<compile_context>
chip_gen: v7x
topology: tpu7x:2x2x1
jax: 0.10.0
libtpu: 0.0.40
codegen_flags: <defaults>
</compile_context>

<pallas_src>
import jax
import jax.numpy as jnp
from jax.experimental import pallas as pl
from jax.experimental.pallas import tpu as pltpu


def _round_up(x, m):
    return ((x + m - 1) // m) * m


def _cdiv(a, b):
    return (a + b - 1) // b


def _vmem_capacity_bytes():
    """Trace-time VMEM capacity query with a conservative (v7x) fallback."""
    try:
        return int(pltpu.get_tpu_info().vmem_capacity_bytes)
    except Exception:
        return 64 * 1024 * 1024


# --------------------------------------------------------------------------
# Stage 1: partial Gram matrices  (NC, B, B) f32  <-  bf16 feature stream
# --------------------------------------------------------------------------
def _gram_kernel(feat_ref, out_ref):
    # out_ref is the (B, B) partial-Gram block for this core; it keeps the
    # same block index across the k (reduction) axis, so it stays resident in
    # VMEM and acts as the accumulator.
    @pl.when(pl.program_id(1) == 0)
    def _init():
        out_ref[...] = jnp.zeros_like(out_ref)

    x = feat_ref[...]                                        # (B, tk) bf16
    # NT contraction (axis 1 of both operands): no explicit x.T relayout.
    out_ref[...] += jax.lax.dot_general(
        x, x,
        dimension_numbers=(((1,), (1,)), ((), ())),
        preferred_element_type=jnp.float32,
    )


# --------------------------------------------------------------------------
# Stage 2: tiny finalize (distances, masks, mean) -> scalar
# --------------------------------------------------------------------------
def _finalize_kernel(margin):
    def kernel(gram_ref, labc_ref, labr_ref, out_ref):
        gram = jnp.sum(gram_ref[...], axis=0)                # (B, B) f32
        b = gram.shape[0]

        # Squared norms off the Gram diagonal: sq[i] = gram[i, i].
        rows = jax.lax.broadcasted_iota(jnp.int32, (b, b), 0)
        cols = jax.lax.broadcasted_iota(jnp.int32, (b, b), 1)
        diag = jnp.where(rows == cols, gram, 0.0)
        sq_col = jnp.sum(diag, axis=1, keepdims=True)        # (B, 1)
        sq_row = jnp.sum(diag, axis=0, keepdims=True)        # (1, B)

        dist2 = jnp.maximum(sq_col + sq_row - 2.0 * gram, 1e-12)
        dist = jnp.sqrt(dist2)

        # Integer label comparison (no float-equality hazard).
        mask_p = (labc_ref[...] == labr_ref[...]).astype(jnp.float32)
        mask_n = 1.0 - mask_p

        # (dist * mask_p)^2 == dist2 * mask_p since mask_p is 0/1.
        loss_p = dist2 * mask_p
        loss_n = jnp.square(jnp.maximum(margin - dist, 0.0)) * mask_n

        out_ref[0, 0] = jnp.mean(loss_p + loss_n)

    return kernel


def rpc_loss(features, labels, margin=2.0):
    """features: (B, C, H, W) float, labels: (B,) int -> scalar loss (f32)."""
    b1 = features.shape[0]
    if b1 == 0:
        # PyTorch returns torch.zeros(1) here; we return a 0-d scalar so both
        # code paths have a consistent (scalar) output.
        return jnp.zeros((), dtype=jnp.float32)

    feat2d = features.reshape(b1, -1)                        # (B, D) view
    D = feat2d.shape[1]
    d128 = _round_up(D, 128)                                 # lane alignment

    # --- generation-aware VMEM budget ---------------------------------------
    vmem_cap = _vmem_capacity_bytes()
    # ~96 MiB on 128 MiB parts (v5e/v6e), ~48 MiB on v7x (64 MiB / TC).
    vmem_limit = min((vmem_cap * 3) // 4, 96 * 1024 * 1024)
    gram_bytes = 2 * b1 * b1 * 4                             # double-buffered out block
    slack = 2 * 1024 * 1024
    per_buf = max(128 * 1024, (vmem_limit - gram_bytes - slack) // 2)
    # Largest 128-aligned bf16 D-tile whose double-buffered copies fit.
    max_tk = max(128, (per_buf // (b1 * 2)) // 128 * 128)

    # --- tile layout: NC cores x nk_pc tiles of width tk --------------------
    NC = 2 if d128 >= 256 else 1                             # D split across TCs (v7x)
    nk_pc = max(1, _cdiv(d128, NC * max_tk))                 # tiles per core
    tk = _round_up(_cdiv(d128, NC * nk_pc), 128)             # actual tile width
    Dp = NC * nk_pc * tk                                     # <= d128 + NC*nk_pc*128

    # Single pass: f32 -> bf16 cast fused with the (small) zero pad by XLA.
    feat2d = feat2d.astype(jnp.bfloat16)
    if Dp != D:
        feat2d = jnp.pad(feat2d, ((0, 0), (0, Dp - D)))      # zeros don't change x@x.T

    lab = labels.reshape(-1).astype(jnp.int32)
    lab_col = lab.reshape(b1, 1)
    lab_row = lab.reshape(1, b1)

    # Stage 1: stream features, accumulate per-core partial Gram matrices.
    partials = pl.pallas_call(
        _gram_kernel,
        out_shape=jax.ShapeDtypeStruct((NC, b1, b1), jnp.float32),
        grid=(NC, nk_pc),
        in_specs=[
            pl.BlockSpec((b1, tk), lambda c, k: (0, c * nk_pc + k)),
        ],
        out_specs=pl.BlockSpec((None, b1, b1), lambda c, k: (c, 0, 0)),
        compiler_params=pltpu.CompilerParams(
            dimension_semantics=("parallel", "arbitrary"),
            vmem_limit_bytes=int(vmem_limit),
        ),
    )(feat2d)

    # Stage 2: tiny epilogue (sum partials, distances, masks, mean).
    out = pl.pallas_call(
        _finalize_kernel(float(margin)),
        out_shape=jax.ShapeDtypeStruct((1, 1), jnp.float32),
        in_specs=[
            pl.BlockSpec(memory_space=pltpu.MemorySpace.VMEM),
            pl.BlockSpec(memory_space=pltpu.MemorySpace.VMEM),
            pl.BlockSpec(memory_space=pltpu.MemorySpace.VMEM),
        ],
        out_specs=pl.BlockSpec(memory_space=pltpu.MemorySpace.SMEM),
    )(partials, lab_col, lab_row)
    return out[0, 0]


def rpc_loss_ref(features, labels, margin=2.0):
    """Pure-JAX reference mirroring the PyTorch code (for sanity check)."""
    b1 = features.shape[0]
    x = features.reshape(b1, -1).astype(jnp.float32)
    sq = jnp.sum(x * x, axis=1, keepdims=True)
    dist2 = sq + sq.T - 2.0 * (x @ x.T)
    dist = jnp.sqrt(jnp.maximum(dist2, 1e-12))
    lab = labels.reshape(-1, 1)
    mask_p = (lab == lab.T).astype(jnp.float32)
    mask_n = 1.0 - mask_p
    loss_p = jnp.square(dist * mask_p)
    loss_n = jnp.square(jnp.maximum(margin - dist, 0.0)) * mask_n
    return jnp.mean(loss_p + loss_n)


if __name__ == "__main__":
    key = jax.random.PRNGKey(0)
    kf, kl = jax.random.split(key)

    # Shapes consistent with the module: [b1, dim, h, w] and [b1].
    B, C, H, W = 8, 4, 16, 16            # D = 1024 -> one 512-wide tile per core
    features = jax.random.normal(kf, (B, C, H, W), dtype=jnp.float32)
    labels = jax.random.randint(kl, (B,), 0, 3, dtype=jnp.int32)

    loss = jax.block_until_ready(rpc_loss(features, labels, margin=2.0))
    ref = rpc_loss_ref(features, labels, margin=2.0)
    # Tolerance covers bf16 streaming / MXU default-precision differences vs
    # the XLA f32 reference matmul; real bugs are >> 2% off.
    assert jnp.allclose(loss, ref, rtol=2e-2, atol=1e-2), (loss, ref)

    # Unaligned case: D not a multiple of 128 and b1 not a multiple of 8
    # (exercises the small-pad path and full-array block shapes).
    kf2, kl2 = jax.random.split(kl)
    B2, C2, H2, W2 = 5, 3, 7, 9          # D = 189
    features2 = jax.random.normal(kf2, (B2, C2, H2, W2), dtype=jnp.float32)
    labels2 = jax.random.randint(kl2, (B2,), 0, 2, dtype=jnp.int32)

    loss2 = jax.block_until_ready(rpc_loss(features2, labels2, margin=2.0))
    ref2 = rpc_loss_ref(features2, labels2, margin=2.0)
    assert jnp.allclose(loss2, ref2, rtol=2e-2, atol=1e-2), (loss2, ref2)

    print("KERNEL_OK")
</pallas_src>

<mosaic_0001>
module attributes {stable_mosaic.version = 11 : i64} {
  func.func @_gram_kernel(%arg0: i32, %arg1: i32, %arg2: memref<8x512xbf16, #tpu.memory_space<vmem>>, %arg3: memref<1x8x8xf32, #tpu.memory_space<vmem>>) attributes {dimension_semantics = [#tpu.dimension_semantics<parallel>, #tpu.dimension_semantics<arbitrary>], iteration_bounds = array<i64: 2, 1>, scalar_prefetch = 0 : i64, scratch_operands = 0 : i64, tpu.core_type = #tpu.core_type<tc>, window_params = [{transform_indices = @transform_0, window_bounds = array<i64: 8, 512>}, {transform_indices = @transform_1, window_bounds = array<i64: 1, 8, 8>}]} {
    %c0_i32 = arith.constant 0 : i32
    %0 = arith.cmpi eq, %arg1, %c0_i32 : i32
    %1 = arith.extui %0 : i1 to i32
    %c0_i32_0 = arith.constant 0 : i32
    %2 = arith.cmpi ne, %1, %c0_i32_0 : i32
    scf.if %2 {
      %cst_8 = arith.constant 0.000000e+00 : f32
      %11 = vector.broadcast %cst_8 : f32 to vector<8x8xf32>
      %c0_9 = arith.constant 0 : index
      %c0_10 = arith.constant 0 : index
      %c0_11 = arith.constant 0 : index
      %12 = vector.load %arg3[%c0_9, %c0_10, %c0_11] : memref<1x8x8xf32, #tpu.memory_space<vmem>>, vector<1x8x8xf32>
      %13 = vector.shape_cast %12 : vector<1x8x8xf32> to vector<8x8xf32>
      %14 = vector.shape_cast %11 : vector<8x8xf32> to vector<1x8x8xf32>
      tpu.vector_store %arg3[%c0_9, %c0_10, %c0_11], %14 {strides = array<i32>} : memref<1x8x8xf32, #tpu.memory_space<vmem>>, vector<1x8x8xf32>,
    } else {
    }
    %c0 = arith.constant 0 : index
    %c0_1 = arith.constant 0 : index
    %3 = vector.load %arg2[%c0, %c0_1] : memref<8x512xbf16, #tpu.memory_space<vmem>>, vector<8x512xbf16>
    %c0_2 = arith.constant 0 : index
    %c0_3 = arith.constant 0 : index
    %c0_4 = arith.constant 0 : index
    %4 = vector.load %arg3[%c0_2, %c0_3, %c0_4] : memref<1x8x8xf32, #tpu.memory_space<vmem>>, vector<1x8x8xf32>
    %5 = vector.shape_cast %4 : vector<1x8x8xf32> to vector<8x8xf32>
    %cst = arith.constant dense<0.000000e+00> : vector<8x8xf32>
    %6 = tpu.matmul %3, %3, %cst {dimension_numbers = #tpu.dot_dimension_numbers<[1], [1], [0], [0], [0, 0, 1, 0], [], []>} : vector<8x512xbf16>, vector<8x512xbf16>, vector<8x8xf32> -> vector<8x8xf32>
    %7 = arith.addf %5, %6 : vector<8x8xf32>
    %c0_5 = arith.constant 0 : index
    %c0_6 = arith.constant 0 : index
    %c0_7 = arith.constant 0 : index
    %8 = vector.load %arg3[%c0_5, %c0_6, %c0_7] : memref<1x8x8xf32, #tpu.memory_space<vmem>>, vector<1x8x8xf32>
    %9 = vector.shape_cast %8 : vector<1x8x8xf32> to vector<8x8xf32>
    %10 = vector.shape_cast %7 : vector<8x8xf32> to vector<1x8x8xf32>
    tpu.vector_store %arg3[%c0_5, %c0_6, %c0_7], %10 {strides = array<i32>} : memref<1x8x8xf32, #tpu.memory_space<vmem>>, vector<1x8x8xf32>,
    return
  }
  func.func @transform_0(%arg0: i32, %arg1: i32) -> (i32, i32) {
    %c1_i32 = arith.constant 1 : i32
    %0 = arith.muli %arg0, %c1_i32 : i32
    %1 = arith.addi %0, %arg1 : i32
    %c0_i32 = arith.constant 0 : i32
    %c0_i32_0 = arith.constant 0 : i32
    return %c0_i32, %1 : i32, i32
  }
  func.func @transform_1(%arg0: i32, %arg1: i32) -> (i32, i32, i32) {
    %c0_i32 = arith.constant 0 : i32
    %c0_i32_0 = arith.constant 0 : i32
    %c0_i32_1 = arith.constant 0 : i32
    return %arg0, %c0_i32, %c0_i32_0 : i32, i32, i32
  }
}

</mosaic_0001>

<bundles_post_ra>
// kernel: tpu_custom_call.1
= control target key start
LH: loop header
LB: loop body
LE: loop exit
PB: predicated region body
PF: predicated region fallthrough
CT: control target
= control target key end

     0   :  { %6 = vsyncpa [#allocation3], 0  ;;  %s738_s0 = inlined_call_operand.hbm [shape: bf16[8,1024], index: 0, kind: input, shape index: {}]   ;;  %s739_s1 = inlined_call_operand.hbm [shape: f32[2,8,8], index: 1, kind: output, shape index: {}]  }
   0x1   :  { %8 = vsyncpa [#allocation3 + $0x1], 0 }
   0x2   :  { %9 = vsyncpa [#allocation4], 0 }
   0x3   :  { %11 = vsyncpa [#allocation4 + $0x1], 0  ;;  %s563_s6 = smov 0   ;;  %s565_s7 = smov 0  }
   0x4   :  { %s567_s8 = smov 0   ;;  %s569_s9 = smov 0  }
   0x5   :  { %s571_s10 = smov 0   ;;  %s573_s11 = smov 0  }
   0x6 LB: > { %s350_s12 = sadd.s32 4294967295, %s548_s11   ;;  %s351_s13 = sadd.s32 4294967294, %s548_s11   ;;  %s548_s11 = sphi %s573_s11, %s17_s11   ;;  %s544_s10 = sphi %s571_s10, %s755_s10   ;;  %s540_s9 = sphi %s569_s9, %s754_s9   ;;  %s536_s8 = sphi %s567_s8, %s753_s8   ;;  %s532_s7 = sphi %s565_s7, %s752_s7   ;;  %s528_s6 = sphi %s563_s6, %s751_s6  }
   0x7   : > { %s29_s14 = sadd.s32 1, %s544_s10  ;;  %s38_s15 = sadd.s32 1, %s536_s8 }
   0x8   : > { %p31_p0 = scmp.ge.s32.totalorder %s29_s14, 2  ;;  %p45_p1 = scmp.ne.s32.totalorder %s536_s8, %s532_s7 }
   0x9   : > { %p46_p2 = scmp.eq.s32.totalorder %s548_s11, 0  ;;  %p51_p3 = scmp.ne.s32.totalorder %s532_s7, %s528_s6 }
   0xa   : > { %s757_s14 = smov (%p31_p0, %s29_s14), 0  ;;  %p52_p5 = scmp.eq.s32.totalorder %s350_s12, 0 }
   0xb   : > { %p604_p4 = por %p46_p2, %p45_p1  ;;  %s35_s17 = ssub.s32 %s544_s10, %s757_s14 }
   0xc   : > { %p75_p6 = scmp.eq.s32.totalorder %s350_s12, 1  ;;  %p36_p7 = scmp.eq.s32.totalorder %s35_s17, 0 }
   0xd   : > { %p610_p8 = por %p52_p5, %p51_p3  ;;  %p81_p10 = scmp.eq.s32.totalorder %s351_s13, 1 }
   0xe   : > { %p614_p9 = por %p75_p6, %p45_p1  ;;  %p381_p13 = scmp.lt.s32.totalorder %s548_s11, 2 }
   0xf   : > { %s619_s20 = scalar_select %p36_p7, %s536_s8, %s38_s15  }
  0x10   : > { %s743_s19 = scalar_select %p614_p9, 1, 0 }
  0x11   : > { %p621_p11 = por %p81_p10, %p51_p3  ;;  %s101_s22 = sand.u32 1, %s536_s8  }
  0x12   : > { %s354_s23 = sshll.u32 %s101_s22, 4  ;;  %s368_s24 = sshll.u32 %s544_s10, 8 }
  0x13   : > { %s744_s21 = scalar_select %p621_p11, 1, 0 }
  0x14   : > { %s632_s27 = scalar_lea.hbm %s738_s0, %s368_s24  ;;  %s105_s28 = scalar_lea.vmem [#allocation2], %s354_s23 }
  0x15   : > { %s114_s29 = sshll.u32 %s105_s28, 4  ;;  %p638_p0 = pnand %p381_p13, %p604_p4  ;;  %s634_s29 = int_to_ptr.vmem [resolvable:$true] %s114_s29 }
  0x16   : > { %s102_s2 = scalar_lea.sflag [#allocation3], %s101_s22  ;;  %s436_s3 = scalar_lea.hbm %s632_s27, 256 }
  0x17   : > { %p437_p3 = scmp.ne.s32.totalorder %s632_s27, %s436_s3  ;;  %p438_p5 = pneg %p638_p0 }
  0x18   : > { %s441_s12 = scalar_lea.hbm %s738_s0, 512  ;;  %p442_p4 = scmp.lt.u32.totalorder %s632_s27, %s738_s0 }
  0x19   : > { %p439_p6 = pnand %p438_p5, %p437_p3  ;;  %p443_p10 = scmp.lt.u32.totalorder %s441_s12, %s436_s3 }
  0x1a   : > { %p445_p12 = scmp.lt.u32.totalorder %s436_s3, %s632_s27 }
  0x1b   : > { %p440_p7 = pneg %p439_p6  ;;  %p444_p13 = por %p443_p10, %p442_p4 }
  0x1d   : > { %p446_p1 = por %p445_p12, %p444_p13 }
  0x1f   : > { %p447_p2 = pnand %p446_p1, %p440_p7 }
  0x21   : > { %450 = shalt.err (!%p447_p2)
}
  0x22   : > { %s451_s16 = scalar_lea.vmem %s634_s29, 256  ;;  %s550_s17 = smov [#allocation2]  }
  0x23   : > { %p452_p3 = scmp.ne.s32.totalorder %s634_s29, %s451_s16  ;;  %s456_s22 = sshll.u32 %s550_s17, 4  ;;  %s457_s22 = int_to_ptr.vmem [resolvable:$false] %s456_s22 }
  0x24   : > { %s458_s23 = scalar_lea.vmem %s457_s22, 512  ;;  %p459_p9 = scmp.lt.s32.totalorder %s634_s29, %s457_s22 }
  0x25   : > { %p454_p6 = pnand %p452_p3, %p438_p5  ;;  %p460_p4 = scmp.lt.s32.totalorder %s458_s23, %s451_s16 }
  0x27   : > { %p455_p11 = pneg %p454_p6  ;;  %p461_p10 = por %p460_p4, %p459_p9 }
  0x29   : > { %p462_p12 = pnand %p461_p10, %p455_p11 }
  0x2b   : > { %465 = shalt.err (!%p462_p12)
}
  0x2c   : > { %376 = dma.hbm_to_vmem [thread:$0]  (!%p638_p0), %s632_s27, 256, %s634_s29, %s102_s2  }
  0x2d   : > { %p746_p1 = scmp.lt.s32.totalorder %s548_s11, 3  ;;  %p747_p2 = scmp.ge.s32.totalorder %s548_s11, 1 }
  0x2f   : > { %p120_p5 = pnand %p747_p2, %p746_p1 }
  0x30   : > { %s674_s24 = sand.u32 (!%p120_p5), 1, %s532_s7  }
  0x31   : > { %123 = sbr.rel (%p120_p5) target bundleno = 298 (0x12a), region = 24  ;;  %s358_s25 = sshll.u32 (!%p120_p5), %s674_s24, 4 }
  0x32   : > { %s126_s26 = scalar_lea.sflag (!%p120_p5), [#allocation3], %s674_s24  ;;  %s129_s28 = scalar_lea.vmem (!%p120_p5), [#allocation2], %s358_s25 }
  0x38   : > { %519 = dma.done.wait (%p610_p8), %s126_s26, 256  }
  0x39   : > { %521 = vsyncadd (%p610_p8), %s126_s26, 4294967040  ;;  %v157_v0 = vld [vmem:[%s129_s28] sm:$0xff]  ;;  %v158_v1 = vld [vmem:[%s129_s28 + $0x8] sm:$0xff]  ;;  %s359_s27 = sshll.u32 %s674_s24, 3  ;;  %vm155_vm0 = vcmask 64512   ;;  %v551_v6 = vmov 0.0  }
  0x3a   : > { %v361_v2 = vcombine.high %v157_v0, %v157_v0  ;;  %v363_v3 = vcombine.high %v158_v1, %v158_v1  ;;  %v360_v4 = vcombine.low %v157_v0, %v157_v0  ;;  %v362_v5 = vcombine.low %v158_v1, %v158_v1  ;;  %s147_s18 = scalar_lea.vmem [#allocation5], %s359_s27  ;;  %s365_s29 = sshll.u32 %s540_s9, 7 }
  0x3b   : > { %156 = vst.msk [vmem:[%s147_s18] sm:$0xff] %vm155_vm0, %v551_v6  ;;  %s271_s30 = sshll.u32 %s147_s18, 4  ;;  %s688_s4 = scalar_lea.hbm %s739_s1, %s365_s29  ;;  %s690_s30 = int_to_ptr.vmem [resolvable:$true] %s271_s30 }
  0x3c   : > { %174 = vmatprep.subr.bf16.mxu0 %v361_v2  ;;  %214 = vmatprep.subr.bf16.mxu1 %v363_v3  ;;  %s258_s9 = scalar_lea.sflag [#allocation4], %s674_s24  ;;  %s466_s5 = scalar_lea.vmem %s690_s30, 128 }
  0x3d   : > { %175 = vmatpush1.bf16.xpose.msra.mxu0 %v360_v4  ;;  %215 = vmatpush1.bf16.xpose.msra.mxu1 %v362_v5  ;;  %p467_p8 = scmp.ne.s32.totalorder %s690_s30, %s466_s5  ;;  %p748_p9 = scmp.ne.s32.totalorder %s743_s19, 0 }
  0x3e   : > { %206 = vmatprep.mubr.bf16.mxu0 %v361_v2  ;;  %246 = vmatprep.mubr.bf16.mxu1 %v363_v3  ;;  %s552_s12 = smov [#allocation5]  }
  0x3f   : > { %p468_p11 = pnand %p467_p8, %p748_p9  ;;  %s470_s13 = sshll.u32 %s552_s12, 4  ;;  %s471_s13 = int_to_ptr.vmem [resolvable:$false] %s470_s13 }
  0x40   : > { %s472_s15 = scalar_lea.vmem %s471_s13, 256  ;;  %p473_p7 = scmp.lt.s32.totalorder %s690_s30, %s471_s13 }
  0x41   : > { %p469_p0 = pneg %p468_p11  ;;  %p474_p13 = scmp.lt.s32.totalorder %s472_s15, %s466_s5 }
  0x42   : > { %v159_v8 = vld [vmem:[%s147_s18] sm:$0xff] }
  0x43   : > { %p475_p3 = por %p474_p13, %p473_p7 }
  0x44   : > { %207 = vmatmul.mubr.bf16.vlgmr.msra.gmra.mrb[0].mxu0 %v360_v4  ;;  %247 = vmatmul.mubr.bf16.vlgmr.msra.gmra.mrb[0].mxu1 %v362_v5 }
  0x45   : > { %p476_p6 = pnand %p475_p3, %p469_p0 }
 0x117   : > { %v208_v7 = vpop.f32.mrb[0].mxu0  ;;  %v248_v9 = vpop.f32.mrb[0].mxu1 }
 0x118   : > { %v249_v10 = vadd.f32 %v248_v9, %v208_v7  ;;  %v210_v11 = vpop.f32.mrb[1].mxu0  ;;  %v250_v12 = vpop.f32.mrb[1].mxu1 }
 0x119   : > { %v211_v13 = vpop.f32.mrb[2].mxu0  ;;  %v251_v14 = vpop.f32.mrb[2].mxu1 }
 0x11a   : > { %v254_v15 = vadd.f32 %v249_v10, %v159_v8  ;;  %v212_v16 = vpop.f32.mrb[3].mxu0  ;;  %v252_v17 = vpop.f32.mrb[3].mxu1 }
 0x11c   : > { %256 = vst.msk [vmem:[%s147_s18] sm:$0xff] %vm155_vm0, %v254_v15 }
 0x11d   : > { %479 = shalt.err (!%p476_p6)
}
 0x11e   : > { %s480_s16 = scalar_lea.hbm %s688_s4, 128  ;;  %s484_s23 = scalar_lea.hbm %s739_s1, 256 }
 0x11f   : > { %p481_p4 = scmp.ne.s32.totalorder %s688_s4, %s480_s16  ;;  %p485_p1 = scmp.lt.u32.totalorder %s688_s4, %s739_s1 }
 0x120   : > { %p486_p2 = scmp.lt.u32.totalorder %s484_s23, %s480_s16  ;;  %p488_p8 = scmp.lt.u32.totalorder %s480_s16, %s688_s4 }
 0x121   : > { %p482_p10 = pnand %p481_p4, %p748_p9 }
 0x122   : > { %p487_p5 = por %p486_p2, %p485_p1 }
 0x123   : > { %p483_p12 = pneg %p482_p10 }
 0x124   : > { %p489_p11 = por %p488_p8, %p487_p5 }
 0x126   : > { %p490_p0 = pnand %p489_p11, %p483_p12 }
 0x128   : > { %493 = shalt.err (!%p490_p0)
}
 0x129   : > { %371 = dma.vmem_to_hbm [thread:$0]  (%p748_p9), %s690_s30, 128, %s688_s4, %s258_s9  }
 0x12a PF: > { %s283_s26 = sand.u32 1, %s528_s6   ;;  %p749_p7 = scmp.ne.s32.totalorder %s744_s21, 0 }
 0x12b   : > { %p750_p13 = scmp.ge.s32.totalorder %s548_s11, 2  ;;  %s284_s28 = scalar_lea.sflag [#allocation4], %s283_s26 }
 0x12d   : > { %p378_p3 = pnand %p750_p13, %p749_p7 }
 0x12f   : > { %523 = dma.done.wait (!%p378_p3), %s284_s28, 128  }
 0x130   : > { %525 = vsyncadd (!%p378_p3), %s284_s28, 4294967168  ;;  %s17_s11 = sadd.s32 1, %s548_s11   ;;  %s751_s6 = smov %s532_s7 }
 0x131   : > { %p14_p6 = scmp.ge.s32.totalorder %s17_s11, 4   ;;  %s752_s7 = smov %s536_s8 }
 0x132   : > { %s753_s8 = smov %s619_s20  ;;  %s754_s9 = smov %s544_s10 }
 0x133   : > { %s755_s10 = smov %s757_s14  ;;  %16 = sbr.rel (!%p14_p6) target bundleno = 6 (0x6), region = 73 }
 0x13a   :  { %289 = vsyncpa [#allocation3], 1 }
 0x13b   :  { %291 = vsyncpa [#allocation3 + $0x1], 1 }
 0x13c   :  { %292 = vsyncpa [#allocation4], 1 }
 0x13d   :  { %294 = vsyncpa [#allocation4 + $0x1], 1 }

</bundles_post_ra>
